<compile_context>
chip_gen: v7x
topology: tpu7x:2x2x1
jax: 0.10.0
libtpu: 0.0.40
codegen_flags: <defaults>
</compile_context>

<pallas_src>
import functools

import jax
import jax.numpy as jnp
from jax.experimental import pallas as pl
from jax.experimental.pallas import tpu as pltpu

LANE = 128        # lane width of the folded layout
TM_MAX = 512      # max sublanes per grid step: 512*128*4B = 256 KiB / component


def _focal_eiou_kernel(b_ref, loss_ref, *, gamma, alpha, eps):
    # b_ref: (8, TM, 128) VMEM tile, rows = (x1, y1, w1, h1, x2, y2, w2, h2)
    # loss_ref: (TM, 128)
    x1 = b_ref[0]
    y1 = b_ref[1]
    w1 = b_ref[2]
    h1 = b_ref[3]
    x2 = b_ref[4]
    y2 = b_ref[5]
    w2 = b_ref[6]
    h2 = b_ref[7]

    # xywh=True branch: convert to corner coords
    hw1 = w1 * 0.5
    hh1 = h1 * 0.5
    hw2 = w2 * 0.5
    hh2 = h2 * 0.5
    b1_x1 = x1 - hw1
    b1_x2 = x1 + hw1
    b1_y1 = y1 - hh1
    b1_y2 = y1 + hh1
    b2_x1 = x2 - hw2
    b2_x2 = x2 + hw2
    b2_y1 = y2 - hh2
    b2_y2 = y2 + hh2

    # IoU (pred/target path in the torch module)
    tl_x = jnp.maximum(b1_x1, b2_x1)
    tl_y = jnp.maximum(b1_y1, b2_y1)
    br_x = jnp.minimum(b1_x2, b2_x2)
    br_y = jnp.minimum(b1_y2, b2_y2)
    area_p = w1 * h1
    area_g = w2 * h2
    en = jnp.where((tl_x < br_x) & (tl_y < br_y), 1.0, 0.0)
    area_i = (br_x - tl_x) * (br_y - tl_y) * en
    area_u = area_p + area_g - area_i
    iou = area_i / (area_u + 1e-16)

    # Enclosing box
    cw = jnp.maximum(b1_x2, b2_x2) - jnp.minimum(b1_x1, b2_x1)
    ch = jnp.maximum(b1_y2, b2_y2) - jnp.minimum(b1_y1, b2_y1)
    cw_sq = cw * cw
    ch_sq = ch * ch
    c2 = cw_sq + ch_sq + eps

    # Simplified EIoU penalties:
    #   (b2_x1+b2_x2-b1_x1-b1_x2)^2/4 == (x2-x1)^2,  b*_x2-b*_x1 == w*
    dx = x2 - x1
    dy = y2 - y1
    rho2 = dx * dx + dy * dy
    dw = w2 - w1
    dh = h2 - h1
    rho_w2 = dw * dw
    rho_h2 = dh * dh

    if alpha == 1.0:
        # default path: no pow, reuse the squares already computed for c2
        cw2 = cw_sq + eps
        ch2 = ch_sq + eps
    else:
        cw2 = jnp.power(cw_sq + eps, alpha)
        ch2 = jnp.power(ch_sq + eps, alpha)

    focal_eiou = iou - (rho2 / c2 + rho_w2 / cw2 + rho_h2 / ch2)
    # torch uses .detach() on the weight — forward value identical.
    # Note: gamma == 0 with iou == 0 would give exp(0 * -inf) = NaN; the
    # module's default gamma=0.8 is safe (0^0.8 == 0), as are padded boxes.
    weight = jnp.power(iou, gamma)

    loss_ref[...] = (1.0 - focal_eiou) * weight


def _tile_plan(n):
    """Pick (tm, m) so blocks are 8-sublane aligned, <= TM_MAX, grid >= 2 when possible."""
    m_raw = -(-n // LANE)  # ceil(n / 128) sublane rows of the folded layout
    if m_raw <= 8:
        tm = m_raw                       # tiny input: one full-extent block
    else:
        half = -(-m_raw // 2)
        tm = min(TM_MAX, ((half + 7) // 8) * 8)
    m = -(-m_raw // tm) * tm
    return tm, m


@functools.partial(jax.jit,
                   static_argnames=("reduction", "gamma", "alpha", "eps"))
def _focaleiou_impl(box1, box2, reduction, gamma, alpha, eps):
    n = box1.shape[0]
    tm, m = _tile_plan(n)
    n_pad = m * LANE

    # Single fused component-major input (8, M, 128).  Under jit this
    # concat/transpose/pad/reshape collapses into one XLA copy fusion
    # (one extra HBM pass over the 32 B/box of inputs); padded lanes are
    # zero boxes -> loss 0, sliced away below.
    b = jnp.concatenate(
        [box1.astype(jnp.float32), box2.astype(jnp.float32)], axis=-1)  # (n, 8)
    bt = jnp.transpose(b, (1, 0))                        # (8, n)
    bt = jnp.pad(bt, ((0, 0), (0, n_pad - n)))
    bpk = bt.reshape(8, m, LANE)

    kernel = functools.partial(_focal_eiou_kernel,
                               gamma=float(gamma), alpha=float(alpha),
                               eps=float(eps))

    grid = (m // tm,)
    loss_pad = pl.pallas_call(
        kernel,
        out_shape=jax.ShapeDtypeStruct((m, LANE), jnp.float32),
        grid_spec=pltpu.PrefetchScalarGridSpec(
            num_scalar_prefetch=0,
            grid=grid,
            in_specs=[pl.BlockSpec((8, tm, LANE), lambda i: (0, i, 0))],
            out_specs=pl.BlockSpec((tm, LANE), lambda i: (i, 0)),
        ),
        compiler_params=pltpu.CompilerParams(
            dimension_semantics=("parallel",)),
    )(bpk)

    loss = loss_pad.reshape(n_pad)[:n].reshape(n, 1)
    if reduction == "mean":
        loss = loss.mean()
    elif reduction == "sum":
        loss = loss.sum()
    return loss


def focaleiou_iouloss(box1, box2, reduction="none", xywh=True,
                      gamma=0.8, alpha=1.0, eps=1e-7):
    """box1, box2: (n, 4) f32 in (x, y, w, h). Returns (n, 1) loss (or reduced)."""
    assert box1.shape == box2.shape and box1.shape[-1] == 4
    if not xywh:
        # TODO(synk): xywh=False branch (corner-format inputs) not wired into the kernel.
        raise NotImplementedError("only xywh=True is supported")
    return _focaleiou_impl(box1, box2, reduction,
                           float(gamma), float(alpha), float(eps))


def _reference(box1, box2, gamma=0.8, alpha=1.0, eps=1e-7):
    # Direct transcription of the PyTorch module's forward (the spec).
    x1, y1, w1, h1 = [box1[:, i:i + 1] for i in range(4)]
    x2, y2, w2, h2 = [box2[:, i:i + 1] for i in range(4)]
    b1_x1, b1_x2, b1_y1, b1_y2 = x1 - w1 / 2, x1 + w1 / 2, y1 - h1 / 2, y1 + h1 / 2
    b2_x1, b2_x2, b2_y1, b2_y2 = x2 - w2 / 2, x2 + w2 / 2, y2 - h2 / 2, y2 + h2 / 2
    tl = jnp.maximum(box1[:, :2] - box1[:, 2:] / 2, box2[:, :2] - box2[:, 2:] / 2)
    br = jnp.minimum(box1[:, :2] + box1[:, 2:] / 2, box2[:, :2] + box2[:, 2:] / 2)
    area_p = jnp.prod(box1[:, 2:], 1)
    area_g = jnp.prod(box2[:, 2:], 1)
    en = jnp.prod((tl < br).astype(tl.dtype), axis=1)
    area_i = jnp.prod(br - tl, 1) * en
    area_u = area_p + area_g - area_i
    iou = (area_i / (area_u + 1e-16)).reshape(-1, 1)
    cw = jnp.maximum(b1_x2, b2_x2) - jnp.minimum(b1_x1, b2_x1)
    ch = jnp.maximum(b1_y2, b2_y2) - jnp.minimum(b1_y1, b2_y1)
    c2 = cw ** 2 + ch ** 2 + eps
    rho2 = ((b2_x1 + b2_x2 - b1_x1 - b1_x2) ** 2
            + (b2_y1 + b2_y2 - b1_y1 - b1_y2) ** 2) / 4
    rho_w2 = (b2_x2 - b2_x1 - (b1_x2 - b1_x1)) ** 2
    rho_h2 = (b2_y2 - b2_y1 - (b1_y2 - b1_y1)) ** 2
    cw2 = jnp.power(cw ** 2 + eps, alpha)
    ch2 = jnp.power(ch ** 2 + eps, alpha)
    f0 = iou - (rho2 / c2 + rho_w2 / cw2 + rho_h2 / ch2)
    return (1.0 - f0) * jnp.power(iou, gamma)


def _make_boxes(key, n):
    k1, k2, k3, k4 = jax.random.split(key, 4)
    # centers in [0, 10), positive widths/heights in [0.5, 3.5)
    box1 = jnp.concatenate([
        jax.random.uniform(k1, (n, 2), jnp.float32) * 10.0,
        jax.random.uniform(k2, (n, 2), jnp.float32) * 3.0 + 0.5,
    ], axis=-1)
    box2 = jnp.concatenate([
        jax.random.uniform(k3, (n, 2), jnp.float32) * 10.0,
        jax.random.uniform(k4, (n, 2), jnp.float32) * 3.0 + 0.5,
    ], axis=-1)
    return box1, box2


if __name__ == "__main__":
    key = jax.random.PRNGKey(0)
    k_small, k_big = jax.random.split(key, 2)

    # small case (single full-extent block, grid=(1,))
    n = 8
    box1, box2 = _make_boxes(k_small, n)
    loss = focaleiou_iouloss(box1, box2, reduction="none")
    jax.block_until_ready(loss)
    ref = _reference(box1, box2)
    assert loss.shape == (n, 1)
    assert jnp.allclose(loss, ref, atol=1e-5, rtol=1e-5), (loss, ref)

    # larger case exercising the multi-block / padded grid path (grid >= 2)
    n2 = 3000
    b1b, b2b = _make_boxes(k_big, n2)
    loss2 = focaleiou_iouloss(b1b, b2b, reduction="none")
    jax.block_until_ready(loss2)
    ref2 = _reference(b1b, b2b)
    assert loss2.shape == (n2, 1)
    assert jnp.allclose(loss2, ref2, atol=1e-5, rtol=1e-5)

    # reduced ('mean') path, fused into the same jitted executable
    loss_mean = focaleiou_iouloss(b1b, b2b, reduction="mean")
    jax.block_until_ready(loss_mean)
    assert jnp.allclose(loss_mean, ref2.mean(), atol=1e-5, rtol=1e-5)

    print("KERNEL_OK")
</pallas_src>

<mosaic_0001>
module attributes {stable_mosaic.version = 11 : i64} {
  func.func @_focal_eiou_kernel(%arg0: i32, %arg1: memref<8x1x128xf32, #tpu.memory_space<vmem>>, %arg2: memref<1x128xf32, #tpu.memory_space<vmem>>) attributes {dimension_semantics = [#tpu.dimension_semantics<parallel>], iteration_bounds = array<i64: 1>, scalar_prefetch = 0 : i64, scratch_operands = 0 : i64, tpu.core_type = #tpu.core_type<tc>, window_params = [{transform_indices = @transform_0, window_bounds = array<i64: 8, 1, 128>}, {transform_indices = @transform_1, window_bounds = array<i64: 1, 128>}]} {
    %c0 = arith.constant 0 : index
    %c0_0 = arith.constant 0 : index
    %c0_1 = arith.constant 0 : index
    %0 = vector.load %arg1[%c0, %c0_0, %c0_1] : memref<8x1x128xf32, #tpu.memory_space<vmem>>, vector<1x1x128xf32>
    %1 = vector.shape_cast %0 : vector<1x1x128xf32> to vector<1x128xf32>
    %c1 = arith.constant 1 : index
    %c0_2 = arith.constant 0 : index
    %c0_3 = arith.constant 0 : index
    %2 = vector.load %arg1[%c1, %c0_2, %c0_3] : memref<8x1x128xf32, #tpu.memory_space<vmem>>, vector<1x1x128xf32>
    %3 = vector.shape_cast %2 : vector<1x1x128xf32> to vector<1x128xf32>
    %c2 = arith.constant 2 : index
    %c0_4 = arith.constant 0 : index
    %c0_5 = arith.constant 0 : index
    %4 = vector.load %arg1[%c2, %c0_4, %c0_5] : memref<8x1x128xf32, #tpu.memory_space<vmem>>, vector<1x1x128xf32>
    %5 = vector.shape_cast %4 : vector<1x1x128xf32> to vector<1x128xf32>
    %c3 = arith.constant 3 : index
    %c0_6 = arith.constant 0 : index
    %c0_7 = arith.constant 0 : index
    %6 = vector.load %arg1[%c3, %c0_6, %c0_7] : memref<8x1x128xf32, #tpu.memory_space<vmem>>, vector<1x1x128xf32>
    %7 = vector.shape_cast %6 : vector<1x1x128xf32> to vector<1x128xf32>
    %c4 = arith.constant 4 : index
    %c0_8 = arith.constant 0 : index
    %c0_9 = arith.constant 0 : index
    %8 = vector.load %arg1[%c4, %c0_8, %c0_9] : memref<8x1x128xf32, #tpu.memory_space<vmem>>, vector<1x1x128xf32>
    %9 = vector.shape_cast %8 : vector<1x1x128xf32> to vector<1x128xf32>
    %c5 = arith.constant 5 : index
    %c0_10 = arith.constant 0 : index
    %c0_11 = arith.constant 0 : index
    %10 = vector.load %arg1[%c5, %c0_10, %c0_11] : memref<8x1x128xf32, #tpu.memory_space<vmem>>, vector<1x1x128xf32>
    %11 = vector.shape_cast %10 : vector<1x1x128xf32> to vector<1x128xf32>
    %c6 = arith.constant 6 : index
    %c0_12 = arith.constant 0 : index
    %c0_13 = arith.constant 0 : index
    %12 = vector.load %arg1[%c6, %c0_12, %c0_13] : memref<8x1x128xf32, #tpu.memory_space<vmem>>, vector<1x1x128xf32>
    %13 = vector.shape_cast %12 : vector<1x1x128xf32> to vector<1x128xf32>
    %c7 = arith.constant 7 : index
    %c0_14 = arith.constant 0 : index
    %c0_15 = arith.constant 0 : index
    %14 = vector.load %arg1[%c7, %c0_14, %c0_15] : memref<8x1x128xf32, #tpu.memory_space<vmem>>, vector<1x1x128xf32>
    %15 = vector.shape_cast %14 : vector<1x1x128xf32> to vector<1x128xf32>
    %cst = arith.constant 5.000000e-01 : f32
    %16 = vector.broadcast %cst : f32 to vector<1x128xf32>
    %17 = arith.mulf %5, %16 : vector<1x128xf32>
    %cst_16 = arith.constant 5.000000e-01 : f32
    %18 = vector.broadcast %cst_16 : f32 to vector<1x128xf32>
    %19 = arith.mulf %7, %18 : vector<1x128xf32>
    %cst_17 = arith.constant 5.000000e-01 : f32
    %20 = vector.broadcast %cst_17 : f32 to vector<1x128xf32>
    %21 = arith.mulf %13, %20 : vector<1x128xf32>
    %cst_18 = arith.constant 5.000000e-01 : f32
    %22 = vector.broadcast %cst_18 : f32 to vector<1x128xf32>
    %23 = arith.mulf %15, %22 : vector<1x128xf32>
    %24 = arith.subf %1, %17 : vector<1x128xf32>
    %25 = arith.addf %1, %17 : vector<1x128xf32>
    %26 = arith.subf %3, %19 : vector<1x128xf32>
    %27 = arith.addf %3, %19 : vector<1x128xf32>
    %28 = arith.subf %9, %21 : vector<1x128xf32>
    %29 = arith.addf %9, %21 : vector<1x128xf32>
    %30 = arith.subf %11, %23 : vector<1x128xf32>
    %31 = arith.addf %11, %23 : vector<1x128xf32>
    %32 = arith.maximumf %24, %28 : vector<1x128xf32>
    %33 = arith.maximumf %26, %30 : vector<1x128xf32>
    %34 = arith.minimumf %25, %29 : vector<1x128xf32>
    %35 = arith.minimumf %27, %31 : vector<1x128xf32>
    %36 = arith.mulf %5, %7 : vector<1x128xf32>
    %37 = arith.mulf %13, %15 : vector<1x128xf32>
    %38 = arith.cmpf olt, %32, %34 : vector<1x128xf32>
    %39 = arith.cmpf olt, %33, %35 : vector<1x128xf32>
    %40 = arith.andi %38, %39 : vector<1x128xi1>
    %cst_19 = arith.constant 1.000000e+00 : f32
    %cst_20 = arith.constant 0.000000e+00 : f32
    %41 = vector.broadcast %cst_19 : f32 to vector<1x128xf32>
    %42 = vector.broadcast %cst_20 : f32 to vector<1x128xf32>
    %43 = arith.select %40, %41, %42 : vector<1x128xi1>, vector<1x128xf32>
    %44 = arith.subf %34, %32 : vector<1x128xf32>
    %45 = arith.subf %35, %33 : vector<1x128xf32>
    %46 = arith.mulf %44, %45 : vector<1x128xf32>
    %47 = arith.mulf %46, %43 : vector<1x128xf32>
    %48 = arith.addf %36, %37 : vector<1x128xf32>
    %49 = arith.subf %48, %47 : vector<1x128xf32>
    %cst_21 = arith.constant 1.000000e-16 : f32
    %50 = vector.broadcast %cst_21 : f32 to vector<1x128xf32>
    %51 = arith.addf %49, %50 : vector<1x128xf32>
    %52 = arith.divf %47, %51 : vector<1x128xf32>
    %53 = arith.maximumf %25, %29 : vector<1x128xf32>
    %54 = arith.minimumf %24, %28 : vector<1x128xf32>
    %55 = arith.subf %53, %54 : vector<1x128xf32>
    %56 = arith.maximumf %27, %31 : vector<1x128xf32>
    %57 = arith.minimumf %26, %30 : vector<1x128xf32>
    %58 = arith.subf %56, %57 : vector<1x128xf32>
    %59 = arith.mulf %55, %55 : vector<1x128xf32>
    %60 = arith.mulf %58, %58 : vector<1x128xf32>
    %61 = arith.addf %59, %60 : vector<1x128xf32>
    %cst_22 = arith.constant 1.000000e-07 : f32
    %62 = vector.broadcast %cst_22 : f32 to vector<1x128xf32>
    %63 = arith.addf %61, %62 : vector<1x128xf32>
    %64 = arith.subf %9, %1 : vector<1x128xf32>
    %65 = arith.subf %11, %3 : vector<1x128xf32>
    %66 = arith.mulf %64, %64 : vector<1x128xf32>
    %67 = arith.mulf %65, %65 : vector<1x128xf32>
    %68 = arith.addf %66, %67 : vector<1x128xf32>
    %69 = arith.subf %13, %5 : vector<1x128xf32>
    %70 = arith.subf %15, %7 : vector<1x128xf32>
    %71 = arith.mulf %69, %69 : vector<1x128xf32>
    %72 = arith.mulf %70, %70 : vector<1x128xf32>
    %cst_23 = arith.constant 1.000000e-07 : f32
    %73 = vector.broadcast %cst_23 : f32 to vector<1x128xf32>
    %74 = arith.addf %59, %73 : vector<1x128xf32>
    %cst_24 = arith.constant 1.000000e-07 : f32
    %75 = vector.broadcast %cst_24 : f32 to vector<1x128xf32>
    %76 = arith.addf %60, %75 : vector<1x128xf32>
    %77 = arith.divf %68, %63 : vector<1x128xf32>
    %78 = arith.divf %71, %74 : vector<1x128xf32>
    %79 = arith.addf %77, %78 : vector<1x128xf32>
    %80 = arith.divf %72, %76 : vector<1x128xf32>
    %81 = arith.addf %79, %80 : vector<1x128xf32>
    %82 = arith.subf %52, %81 : vector<1x128xf32>
    %cst_25 = arith.constant 8.000000e-01 : f32
    %83 = vector.broadcast %cst_25 : f32 to vector<1x128xf32>
    %84 = math.powf %52, %83 : vector<1x128xf32>
    %cst_26 = arith.constant 1.000000e+00 : f32
    %85 = vector.broadcast %cst_26 : f32 to vector<1x128xf32>
    %86 = arith.subf %85, %82 : vector<1x128xf32>
    %87 = arith.mulf %86, %84 : vector<1x128xf32>
    %c0_27 = arith.constant 0 : index
    %c0_28 = arith.constant 0 : index
    %88 = vector.load %arg2[%c0_27, %c0_28] : memref<1x128xf32, #tpu.memory_space<vmem>>, vector<1x128xf32>
    tpu.vector_store %arg2[%c0_27, %c0_28], %87 {strides = array<i32>} : memref<1x128xf32, #tpu.memory_space<vmem>>, vector<1x128xf32>,
    return
  }
  func.func @transform_0(%arg0: i32) -> (i32, i32, i32) {
    %c0_i32 = arith.constant 0 : i32
    %c0_i32_0 = arith.constant 0 : i32
    %c0_i32_1 = arith.constant 0 : i32
    return %c0_i32, %arg0, %c0_i32_0 : i32, i32, i32
  }
  func.func @transform_1(%arg0: i32) -> (i32, i32) {
    %c0_i32 = arith.constant 0 : i32
    %c0_i32_0 = arith.constant 0 : i32
    return %arg0, %c0_i32 : i32, i32
  }
}

</mosaic_0001>

<bundles_post_ra>
// kernel: _focaleiou_impl.1
= control target key start
LH: loop header
LB: loop body
LE: loop exit
PB: predicated region body
PF: predicated region fallthrough
CT: control target
= control target key end

     0   :  { %v138_v32 = vmov 0.0   ;;  %s176_s0 = inlined_call_operand.vmem [shape: f32[8,1,128], index: 0, kind: input, shape index: {}]   ;;  %s177_s1 = inlined_call_operand.vmem [shape: f32[1,128], index: 1, kind: output, shape index: {}]  }
   0x1   :  { %v8_v0 = vld [vmem:[%s176_s0] sm:$0x1]  ;;  %v92_v1 = vld [vmem:[%s176_s0 + $0x1] sm:$0x1]  ;;  %v93_v2 = vld [vmem:[%s176_s0 + $0x2] sm:$0x1] }
   0x2   :  { %v94_v3 = vld [vmem:[%s176_s0 + $0x3] sm:$0x1]  ;;  %v95_v4 = vld [vmem:[%s176_s0 + $0x4] sm:$0x1]  ;;  %v96_v5 = vld [vmem:[%s176_s0 + $0x5] sm:$0x1] }
   0x3   :  { %v97_v6 = vld [vmem:[%s176_s0 + $0x6] sm:$0x1]  ;;  %v98_v7 = vld [vmem:[%s176_s0 + $0x7] sm:$0x1]  ;;  %v23_v8 = vmul.f32 0.5, %v93_v2  ;;  %v24_v9 = vmul.f32 0.5, %v94_v3  ;;  %v39_v20 = vmul.f32 %v94_v3, %v93_v2  ;;  %v64_v49 = vsub.f32 %v95_v4, %v8_v0 }
   0x4   :  { %v25_v10 = vmul.f32 0.5, %v97_v6  ;;  %v26_v11 = vmul.f32 0.5, %v98_v7  ;;  %v40_v21 = vmul.f32 %v98_v7, %v97_v6  ;;  %v65_v50 = vsub.f32 %v96_v5, %v92_v1 }
   0x5   :  { %v27_v12 = vsub.f32 %v8_v0, %v23_v8  ;;  %v28_v13 = vadd.f32 %v23_v8, %v8_v0  ;;  %v29_v14 = vsub.f32 %v92_v1, %v24_v9  ;;  %v30_v15 = vadd.f32 %v92_v1, %v24_v9 }
   0x6   :  { %v31_v16 = vsub.f32 %v95_v4, %v25_v10  ;;  %v32_v17 = vadd.f32 %v95_v4, %v25_v10  ;;  %v33_v18 = vsub.f32 %v96_v5, %v26_v11  ;;  %v34_v19 = vadd.f32 %v96_v5, %v26_v11 }
   0x7   :  { %v49_v35 = vadd.f32 %v40_v21, %v39_v20  ;;  %v66_v52 = vmul.f32 %v64_v49, %v64_v49  ;;  %v67_v53 = vmul.f32 %v65_v50, %v65_v50  ;;  %v69_v54 = vsub.f32 %v97_v6, %v93_v2 }
   0x8   :  { %v35_v22 = vmax.f32 %v27_v12, %v31_v16  ;;  %v36_v23 = vmax.f32 %v29_v14, %v33_v18  ;;  %v37_v24 = vmin.f32 %v28_v13, %v32_v17  ;;  %v38_v25 = vmin.f32 %v30_v15, %v34_v19 }
   0x9   :  { %v54_v28 = vmax.f32 %v28_v13, %v32_v17  ;;  %v55_v29 = vmin.f32 %v27_v12, %v31_v16  ;;  %v57_v30 = vmax.f32 %v30_v15, %v34_v19  ;;  %v58_v31 = vmin.f32 %v29_v14, %v33_v18 }
   0xa   :  { %vm41_vm0 = vcmp.lt.f32.partialorder %v35_v22, %v37_v24  ;;  %vm42_vm1 = vcmp.lt.f32.partialorder %v36_v23, %v38_v25  ;;  %v45_v26 = vsub.f32 %v37_v24, %v35_v22  ;;  %v46_v27 = vsub.f32 %v38_v25, %v36_v23 }
   0xb   :  { %vm43_vm2 = vmand %vm41_vm0, %vm42_vm1  ;;  %v56_v37 = vsub.f32 %v54_v28, %v55_v29  ;;  %v59_v38 = vsub.f32 %v57_v30, %v58_v31  ;;  %v68_v56 = vadd.f32 %v67_v53, %v66_v52  ;;  %v70_v57 = vsub.f32 %v98_v7, %v94_v3 }
   0xc   :  { %v44_v33 = vsel %vm43_vm2, 1.0, %v138_v32  ;;  %v47_v34 = vmul.f32 %v46_v27, %v45_v26  ;;  %v71_v58 = vmul.f32 %v69_v54, %v69_v54 }
   0xd   :  { %v60_v41 = vmul.f32 %v56_v37, %v56_v37  ;;  %v61_v42 = vmul.f32 %v59_v38, %v59_v38  ;;  %v72_v61 = vmul.f32 %v70_v57, %v70_v57 }
   0xe   :  { %v48_v36 = vmul.f32 %v47_v34, %v44_v33 }
   0xf   :  { %v62_v43 = vadd.f32 %v61_v42, %v60_v41  ;;  %v73_v44 = vadd.f32 1e-07, %v60_v41  ;;  %v74_v47 = vadd.f32 1e-07, %v61_v42 }
  0x10   :  { %v50_v39 = vsub.f32 %v49_v35, %v48_v36 }
  0x11   :  { %v63_v45 = vadd.f32 1e-07, %v62_v43 }
  0x12   :  { %v51_v40 = vadd.f32 1e-16, %v50_v39 }
  0x14   :  { %126 = vrcp.f32 %v51_v40 }
  0x15   :  { %128 = vrcp.f32 %v73_v44 }
  0x16   :  { %130 = vrcp.f32 %v63_v45 }
  0x17   :  { %132 = vrcp.f32 %v74_v47 }
  0x1e   :  { %v127_v46 = vpop.eup %126 }
  0x1f   :  { %v53_v48 = vmul.f32 %v127_v46, %v48_v36  ;;  %v129_v55 = vpop.eup %128 }
  0x20   :  { %v131_v59 = vpop.eup %130  ;;  %v78_v63 = vmul.f32 %v129_v55, %v71_v58 }
  0x21   :  { %v103_v51 = vand.u32 2147483647, %v53_v48  ;;  %v133_v60 = vpop.eup %132  ;;  %v76_v62 = vmul.f32 %v131_v59, %v68_v56  ;;  %vm107_vm3 = vcmp.lt.f32.partialorder %v53_v48, 0  ;;  %vm108_vm4 = vcmp.eq.f32.partialorder %v53_v48, 0 }
  0x22   :  { %v81_v0 = vmul.f32 %v133_v60, %v72_v61  ;;  %vm120_vm6 = vcmp.ne.f32.partialorder %v53_v48, %v53_v48  ;;  %vm109_vm7 = vcmp.eq.f32.partialorder %v53_v48, 1065353216 }
  0x23   :  { %134 = vlog2.f32 %v103_v51  ;;  %v79_v10 = vadd.f32 %v78_v63, %v76_v62  ;;  %vm112_vm5 = vcmp.eq.f32.partialorder %v103_v51, 2139095040 }
  0x25   :  { %v82_v1 = vadd.f32 %v81_v0, %v79_v10 }
  0x27   :  { %v83_v4 = vsub.f32 %v53_v48, %v82_v1 }
  0x29   :  { %v85_v6 = vsub.f32 1.0, %v83_v4 }
  0x2d   :  { %v135_v8 = vpop.eup %134 }
  0x2e   :  { %v105_v9 = vmul.f32 0.8, %v135_v8 }
  0x30   :  { %136 = vpow2.f32 %v105_v9 }
  0x3a   :  { %v137_v5 = vpop.eup %136 }
  0x3b   :  { %v113_v2 = vsel %vm107_vm3, 2143289344, %v137_v5 }
  0x3c   :  { %v114_v3 = vsel %vm108_vm4, 0, %v113_v2 }
  0x3d   :  { %v119_v7 = vsel %vm112_vm5, 2139095040, %v114_v3 }
  0x3e   :  { %v123_v11 = vsel %vm120_vm6, 2143289344, %v119_v7 }
  0x3f   :  { %v124_v12 = vsel %vm109_vm7, 1065353216, %v123_v11 }
  0x40   :  { %v86_v13 = vmul.f32 %v124_v12, %v85_v6 }
  0x42   :  { %87 = vst [vmem:[%s177_s1] sm:$0x1] %v86_v13 }

</bundles_post_ra>
